<compile_context>
chip_gen: v7x
topology: tpu7x:2x2x1
jax: 0.10.0
libtpu: 0.0.40
codegen_flags: <defaults>
</compile_context>

<pallas_src>
import functools

import jax
import jax.numpy as jnp
from jax.experimental import pallas as pl
from jax.experimental.pallas import tpu as pltpu


def _round_up(v, k):
    return (v + k - 1) // k * k


# ----------------------------------------------------------------------------
# Fused forward kernel (everything stays in VMEM / vregs)
# ----------------------------------------------------------------------------

def _fused_forward_kernel(x_ref, wa_ref, wb_ref, out_ref, *,
                          tap_w, n2, n3, num_actions):
    f32, bf16 = jnp.float32, jnp.bfloat16
    x = x_ref[...].astype(bf16)                               # (TB, K_pad)

    # conv1 (+bias via the ones column) as ONE block-Toeplitz GEMM, then ReLU.
    # Columns are ordered (pool_tap, i, j, cout), each tap block padded to tap_w
    # lanes (a multiple of 128).
    y1 = jnp.maximum(jnp.dot(x, wa_ref[...], preferred_element_type=f32), 0.0)

    # MaxPool2d(2,2): elementwise max over the four lane-aligned tap blocks.
    # The carried ones column (index hp*wp*16 inside each block) stays 1.0.
    pooled = jnp.maximum(
        jnp.maximum(y1[:, 0 * tap_w:1 * tap_w], y1[:, 1 * tap_w:2 * tap_w]),
        jnp.maximum(y1[:, 2 * tap_w:3 * tap_w], y1[:, 3 * tap_w:4 * tap_w]))

    # Static, tile-aligned slices of the packed weight slab.
    r0 = 0
    w2t = wb_ref[r0:r0 + tap_w, 0:n2]; r0 += tap_w            # conv2 Toeplitz (+b2 row)
    w3t = wb_ref[r0:r0 + n2, 0:n3];    r0 += n2               # conv3 Toeplitz (+b3 row)
    h1w = wb_ref[r0:r0 + n3, 0:128];   r0 += n3               # merged actor/critic L1
    h2w = wb_ref[r0:r0 + 128, 0:128];  r0 += 128              # merged L2 (block-diag)
    h3w = wb_ref[r0:r0 + 128, 0:128]                          # merged L3 (lane-padded)

    # conv2 / conv3 as Toeplitz GEMMs (+ folded biases), ReLU.
    y2 = jnp.maximum(jnp.dot(pooled.astype(bf16), w2t,
                             preferred_element_type=f32), 0.0)   # (TB, n2)
    y3 = jnp.maximum(jnp.dot(y2.astype(bf16), w3t,
                             preferred_element_type=f32), 0.0)   # (TB, n3) = embedding

    # Merged actor/critic heads (biases are structurally zero -> dropped).
    hd1 = jnp.tanh(jnp.dot(y3.astype(bf16), h1w, preferred_element_type=f32))
    hd2 = jnp.tanh(jnp.dot(hd1.astype(bf16), h2w, preferred_element_type=f32))
    out = jnp.dot(hd2.astype(bf16), h3w, preferred_element_type=f32)  # (TB, 128)

    # Masked log_softmax over cols [0, A); col A carries the critic value; rest 0.
    col = jax.lax.broadcasted_iota(jnp.int32, out.shape, 1)
    is_logit = col < num_actions
    neg = jnp.float32(-1e30)
    z = out - jnp.max(jnp.where(is_logit, out, neg), axis=-1, keepdims=True)
    lse = jnp.log(jnp.sum(jnp.where(is_logit, jnp.exp(z), 0.0),
                          axis=-1, keepdims=True))
    res = jnp.where(is_logit, z - lse,
                    jnp.where(col == num_actions, out, 0.0))
    out_ref[...] = res.astype(out_ref.dtype)


# ----------------------------------------------------------------------------
# Wrapper: lane-dense input slab + the pallas_call (batch-gridded)
# ----------------------------------------------------------------------------

def forward(params, obs, num_actions):
    """obs: (B, n, m, 3) float. Returns (log_probs (B, A), value (B,))."""
    bsz, n, m, c = obs.shape
    hp, wp = (n - 1) // 2, (m - 1) // 2
    h2, w2 = hp - 1, wp - 1
    h3, w3 = h2 - 1, w2 - 1
    emb = h3 * w3 * 64

    k_raw = n * m * c
    k_pad = params["wa"].shape[0]
    tap_w = params["wa"].shape[1] // 4
    n2 = _round_up(h2 * w2 * 32 + 1, 128)
    n3 = max(128, _round_up(emb, 128))

    # Flatten obs, append the bias "ones" column, zero-pad to the Toeplitz K.
    x = obs.reshape(bsz, k_raw).astype(jnp.float32)
    x = jnp.concatenate([x, jnp.ones((bsz, 1), jnp.float32)], axis=1)

    tb = 256 if bsz >= 256 else _round_up(bsz, 8)             # batch tile
    bp = _round_up(bsz, tb)
    x = jnp.pad(x, ((0, bp - bsz), (0, k_pad - (k_raw + 1))))

    wa, wb = params["wa"], params["wb"]
    kern = functools.partial(_fused_forward_kernel, tap_w=tap_w, n2=n2, n3=n3,
                             num_actions=num_actions)
    out = pl.pallas_call(
        kern,
        out_shape=jax.ShapeDtypeStruct((bp, 128), jnp.float32),
        grid_spec=pltpu.PrefetchScalarGridSpec(
            num_scalar_prefetch=0,
            grid=(bp // tb,),
            in_specs=[pl.BlockSpec((tb, k_pad), lambda b: (b, 0)),
                      pl.BlockSpec(wa.shape, lambda b: (0, 0)),
                      pl.BlockSpec(wb.shape, lambda b: (0, 0))],
            out_specs=pl.BlockSpec((tb, 128), lambda b: (b, 0))),
        compiler_params=pltpu.CompilerParams(
            dimension_semantics=("parallel",)),
    )(x, wa, wb)

    # TODO(synk): torch returns a Categorical distribution object; we return its
    # normalized logits (log-probabilities), which fully determine it.
    return out[:bsz, :num_actions], out[:bsz, num_actions]


# ----------------------------------------------------------------------------
# Deterministic synthetic parameters: block-Toeplitz folding + packed slabs
# (+ raw pieces for a pure-JAX reference)
# ----------------------------------------------------------------------------

def make_params(key, n, m, num_actions=3):
    hp, wp = (n - 1) // 2, (m - 1) // 2
    h2, w2 = hp - 1, wp - 1
    h3, w3 = h2 - 1, w2 - 1
    emb = h3 * w3 * 64

    k_raw = n * m * 3
    k_pad = _round_up(k_raw + 1, 128)
    tap_w = _round_up(hp * wp * 16 + 1, 128)
    n2 = _round_up(h2 * w2 * 32 + 1, 128)
    n3 = max(128, _round_up(emb, 128))

    keys = jax.random.split(key, 12)
    f32, bf16 = jnp.float32, jnp.bfloat16

    def conv_w(k, ci, co):      # bf16-exact f32 (so Toeplitz folding is lossless)
        w = 0.1 * jax.random.normal(k, (2, 2, ci, co), f32)
        return w.astype(bf16).astype(f32)

    def conv_b(k, co):
        b = 0.01 * jax.random.normal(k, (co,), f32)
        return b.astype(bf16).astype(f32)

    def lin_w(k, cin, cout):    # init_params: N(0,1), normalized per output unit
        w = jax.random.normal(k, (cin, cout), f32)
        return (w / jnp.sqrt(jnp.sum(w * w, axis=0, keepdims=True))).astype(bf16)

    c1_w, c1_b = conv_w(keys[0], 3, 16), conv_b(keys[1], 16)
    c2_w, c2_b = conv_w(keys[2], 16, 32), conv_b(keys[3], 32)
    c3_w, c3_b = conv_w(keys[4], 32, 64), conv_b(keys[5], 64)

    a1, a2 = lin_w(keys[6], emb, 64), lin_w(keys[7], 64, 64)
    a3 = lin_w(keys[8], 64, num_actions)
    v1, v2, v3 = lin_w(keys[9], emb, 64), lin_w(keys[10], 64, 64), lin_w(keys[11], 64, 1)

    dn = ("NHWC", "HWIO", "NHWC")

    def conv2x2(x, w):
        return jax.lax.conv_general_dilated(x[None], w, (1, 1), "VALID",
                                            dimension_numbers=dn)[0]

    # Block-Toeplitz matrices built by linearizing the exact conv maps (f32),
    # with the bias folded in via the carried "ones" column.
    def fn1(v):                              # obs_flat(+1) -> 4 pool-tap blocks
        x = v[:k_raw].reshape(n, m, 3)
        one = v[k_raw]
        y = conv2x2(x, c1_w) + one * c1_b.reshape(1, 1, 16)      # (n-1, m-1, 16)
        taps = []
        for dh in (0, 1):
            for dw in (0, 1):
                t = y[dh:dh + 2 * hp:2, dw:dw + 2 * wp:2, :].reshape(hp * wp * 16)
                t = jnp.concatenate([t, one[None]])              # carry the 1
                taps.append(jnp.pad(t, (0, tap_w - t.shape[0])))
        return jnp.concatenate(taps)                             # (4*tap_w,)

    def fn2(v):                              # pooled(+1) -> conv2 output (+1)
        x = v[:hp * wp * 16].reshape(hp, wp, 16)
        one = v[hp * wp * 16]
        y = conv2x2(x, c2_w) + one * c2_b.reshape(1, 1, 32)      # (h2, w2, 32)
        t = jnp.concatenate([y.reshape(h2 * w2 * 32), one[None]])
        return jnp.pad(t, (0, n2 - t.shape[0]))

    def fn3(v):                              # conv2 out(+1) -> embedding (r,s,c)
        x = v[:h2 * w2 * 32].reshape(h2, w2, 32)
        one = v[h2 * w2 * 32]
        y = conv2x2(x, c3_w) + one * c3_b.reshape(1, 1, 64)      # (h3, w3, 64)
        return jnp.pad(y.reshape(emb), (0, n3 - emb))

    w1t = jax.vmap(fn1)(jnp.eye(k_pad, dtype=f32)).astype(bf16)  # (k_pad, 4*tap_w)
    w2t = jax.vmap(fn2)(jnp.eye(tap_w, dtype=f32)).astype(bf16)  # (tap_w, n2)
    w3t = jax.vmap(fn3)(jnp.eye(n2, dtype=f32)).astype(bf16)     # (n2, n3)

    # Merged heads: actor cols [0,64), critic cols [64,128).  Fold the torch
    # NCHW flatten into the layer-1 rows (identity for the default 7x7 obs).
    r = jnp.arange(emb)
    perm = (r % 64) * (h3 * w3) + (r // 64)
    h1w = jnp.concatenate([a1[perm, :], v1[perm, :]], axis=1)    # (emb, 128)
    h1w = jnp.pad(h1w, ((0, n3 - emb), (0, 0)))                  # (n3, 128)
    z64 = jnp.zeros((64, 64), bf16)
    h2w = jnp.concatenate([jnp.concatenate([a2, z64], 1),
                           jnp.concatenate([z64, v2], 1)], 0)    # (128, 128)
    h3w = jnp.concatenate([jnp.concatenate([a3, jnp.zeros((64, 1), bf16)], 1),
                           jnp.concatenate([jnp.zeros((64, num_actions), bf16), v3], 1)],
                          0)                                     # (128, A+1)
    h3w = jnp.pad(h3w, ((0, 0), (0, 128 - (num_actions + 1))))   # (128, 128)

    # Pack everything except W1T into one lane-padded bf16 slab (2 param DMAs).
    wl = max(n2, n3, 128)

    def padw(x):
        return jnp.pad(x, ((0, 0), (0, wl - x.shape[1])))

    wb = jnp.concatenate([padw(w2t), padw(w3t), padw(h1w), padw(h2w), padw(h3w)],
                         axis=0)                                 # (tap_w+n2+n3+256, wl)

    params = {"wa": w1t, "wb": wb}
    ref = {"c1_w": c1_w, "c1_b": c1_b, "c2_w": c2_w, "c2_b": c2_b,
           "c3_w": c3_w, "c3_b": c3_b,
           "a1_w": a1, "a2_w": a2, "a3_w": a3,
           "v1_w": v1, "v2_w": v2, "v3_w": v3}
    return params, ref


# ----------------------------------------------------------------------------
# Pure-JAX reference (torch semantics: NCHW flatten, separate heads)
# ----------------------------------------------------------------------------

def reference_forward(ref, obs):
    f32, bf16 = jnp.float32, jnp.bfloat16
    dn = ("NHWC", "HWIO", "NHWC")

    def conv(x, w, b):
        y = jax.lax.conv_general_dilated(x.astype(bf16), w.astype(bf16), (1, 1),
                                         "VALID", dimension_numbers=dn,
                                         preferred_element_type=f32)
        return jnp.maximum(y + b.reshape(1, 1, 1, -1), 0.0)

    def lin(x, w):
        return jnp.dot(x.astype(bf16), w, preferred_element_type=f32)

    bsz, n, m, _ = obs.shape
    hp, wp = (n - 1) // 2, (m - 1) // 2

    h = conv(obs.astype(f32), ref["c1_w"], ref["c1_b"])            # (B, n-1, m-1, 16)
    h = h[:, :2 * hp, :2 * wp, :].reshape(bsz, hp, 2, wp, 2, 16).max(axis=(2, 4))
    h = conv(h, ref["c2_w"], ref["c2_b"])
    h = conv(h, ref["c3_w"], ref["c3_b"])
    emb = jnp.transpose(h, (0, 3, 1, 2)).reshape(bsz, -1)          # torch NCHW flatten

    a = jnp.tanh(lin(emb, ref["a1_w"]))
    a = jnp.tanh(lin(a, ref["a2_w"]))
    logp = jax.nn.log_softmax(lin(a, ref["a3_w"]), axis=-1)

    v = jnp.tanh(lin(emb, ref["v1_w"]))
    v = jnp.tanh(lin(v, ref["v2_w"]))
    value = lin(v, ref["v3_w"])[:, 0]
    return logp, value


# ----------------------------------------------------------------------------
# Demo
# ----------------------------------------------------------------------------

if __name__ == "__main__":
    key = jax.random.PRNGKey(0)
    k_obs, k_params = jax.random.split(key)

    B, n, m = 2, 7, 7              # default MiniGrid partial obs: 7x7x3
    num_actions = 3

    obs = jax.random.randint(k_obs, (B, n, m, 3), 0, 11).astype(jnp.float32)
    params, ref = make_params(k_params, n, m, num_actions)

    fwd = jax.jit(forward, static_argnums=2)
    log_probs, value = fwd(params, obs, num_actions)
    log_probs = jax.block_until_ready(log_probs)
    value = jax.block_until_ready(value)

    assert log_probs.shape == (B, num_actions)
    assert value.shape == (B,)
    psum = jnp.exp(log_probs).sum(axis=1)
    assert jnp.allclose(psum, jnp.ones_like(psum), atol=1e-5)

    # Cross-check the fused kernel against a pure-JAX reference of the module
    # (same bf16-operand / f32-accumulate discipline -> tight tolerance).
    ref_logp, ref_value = reference_forward(ref, obs)
    assert jnp.allclose(log_probs, ref_logp, atol=5e-3, rtol=5e-3), (
        float(jnp.max(jnp.abs(log_probs - ref_logp))))
    assert jnp.allclose(value, ref_value, atol=5e-3, rtol=5e-3), (
        float(jnp.max(jnp.abs(value - ref_value))))

    print("KERNEL_OK")
</pallas_src>

<mosaic_0001>
module attributes {stable_mosaic.version = 11 : i64} {
  func.func @_fused_forward_kernel(%arg0: i32, %arg1: memref<8x256xf32, #tpu.memory_space<vmem>>, %arg2: memref<256x1024xbf16, #tpu.memory_space<vmem>>, %arg3: memref<896x256xbf16, #tpu.memory_space<vmem>>, %arg4: memref<8x128xf32, #tpu.memory_space<vmem>>) attributes {dimension_semantics = [#tpu.dimension_semantics<parallel>], iteration_bounds = array<i64: 1>, scalar_prefetch = 0 : i64, scratch_operands = 0 : i64, tpu.core_type = #tpu.core_type<tc>, window_params = [{transform_indices = @transform_0, window_bounds = array<i64: 8, 256>}, {pipeline_mode = #tpu.pipeline_mode<synchronous>, transform_indices = @transform_1, window_bounds = array<i64: 256, 1024>}, {pipeline_mode = #tpu.pipeline_mode<synchronous>, transform_indices = @transform_2, window_bounds = array<i64: 896, 256>}, {transform_indices = @transform_3, window_bounds = array<i64: 8, 128>}]} {
    %c0 = arith.constant 0 : index
    %c0_0 = arith.constant 0 : index
    %0 = vector.load %arg1[%c0, %c0_0] : memref<8x256xf32, #tpu.memory_space<vmem>>, vector<8x256xf32>
    %1 = arith.truncf %0 : vector<8x256xf32> to vector<8x256xbf16>
    %c0_1 = arith.constant 0 : index
    %c0_2 = arith.constant 0 : index
    %2 = vector.load %arg2[%c0_1, %c0_2] : memref<256x1024xbf16, #tpu.memory_space<vmem>>, vector<256x1024xbf16>
    %cst = arith.constant dense<0.000000e+00> : vector<8x1024xf32>
    %3 = tpu.matmul %1, %2, %cst {dimension_numbers = #tpu.dot_dimension_numbers<[1], [0], [0], [1], [0, 0, 1, 1], [], []>} : vector<8x256xbf16>, vector<256x1024xbf16>, vector<8x1024xf32> -> vector<8x1024xf32>
    %cst_3 = arith.constant 0.000000e+00 : f32
    %4 = vector.broadcast %cst_3 : f32 to vector<8x1024xf32>
    %5 = arith.maximumf %3, %4 : vector<8x1024xf32>
    %6 = vector.extract_strided_slice %5 {offsets = [0, 0], sizes = [8, 256], strides = [1, 1]} : vector<8x1024xf32> to vector<8x256xf32>
    %7 = vector.extract_strided_slice %5 {offsets = [0, 256], sizes = [8, 256], strides = [1, 1]} : vector<8x1024xf32> to vector<8x256xf32>
    %8 = arith.maximumf %6, %7 : vector<8x256xf32>
    %9 = vector.extract_strided_slice %5 {offsets = [0, 512], sizes = [8, 256], strides = [1, 1]} : vector<8x1024xf32> to vector<8x256xf32>
    %10 = vector.extract_strided_slice %5 {offsets = [0, 768], sizes = [8, 256], strides = [1, 1]} : vector<8x1024xf32> to vector<8x256xf32>
    %11 = arith.maximumf %9, %10 : vector<8x256xf32>
    %12 = arith.maximumf %8, %11 : vector<8x256xf32>
    %c0_4 = arith.constant 0 : index
    %c0_5 = arith.constant 0 : index
    %13 = vector.load %arg3[%c0_4, %c0_5] : memref<896x256xbf16, #tpu.memory_space<vmem>>, vector<256x256xbf16>
    %c256 = arith.constant 256 : index
    %c0_6 = arith.constant 0 : index
    %14 = vector.load %arg3[%c256, %c0_6] : memref<896x256xbf16, #tpu.memory_space<vmem>>, vector<256x128xbf16>
    %c512 = arith.constant 512 : index
    %c0_7 = arith.constant 0 : index
    %15 = vector.load %arg3[%c512, %c0_7] : memref<896x256xbf16, #tpu.memory_space<vmem>>, vector<128x128xbf16>
    %c640 = arith.constant 640 : index
    %c0_8 = arith.constant 0 : index
    %16 = vector.load %arg3[%c640, %c0_8] : memref<896x256xbf16, #tpu.memory_space<vmem>>, vector<128x128xbf16>
    %c768 = arith.constant 768 : index
    %c0_9 = arith.constant 0 : index
    %17 = vector.load %arg3[%c768, %c0_9] : memref<896x256xbf16, #tpu.memory_space<vmem>>, vector<128x128xbf16>
    %18 = arith.truncf %12 : vector<8x256xf32> to vector<8x256xbf16>
    %cst_10 = arith.constant dense<0.000000e+00> : vector<8x256xf32>
    %19 = tpu.matmul %18, %13, %cst_10 {dimension_numbers = #tpu.dot_dimension_numbers<[1], [0], [0], [1], [0, 0, 1, 1], [], []>} : vector<8x256xbf16>, vector<256x256xbf16>, vector<8x256xf32> -> vector<8x256xf32>
    %cst_11 = arith.constant 0.000000e+00 : f32
    %20 = vector.broadcast %cst_11 : f32 to vector<8x256xf32>
    %21 = arith.maximumf %19, %20 : vector<8x256xf32>
    %22 = arith.truncf %21 : vector<8x256xf32> to vector<8x256xbf16>
    %cst_12 = arith.constant dense<0.000000e+00> : vector<8x128xf32>
    %23 = tpu.matmul %22, %14, %cst_12 {dimension_numbers = #tpu.dot_dimension_numbers<[1], [0], [0], [1], [0, 0, 1, 1], [], []>} : vector<8x256xbf16>, vector<256x128xbf16>, vector<8x128xf32> -> vector<8x128xf32>
    %cst_13 = arith.constant 0.000000e+00 : f32
    %24 = vector.broadcast %cst_13 : f32 to vector<8x128xf32>
    %25 = arith.maximumf %23, %24 : vector<8x128xf32>
    %26 = arith.truncf %25 : vector<8x128xf32> to vector<8x128xbf16>
    %cst_14 = arith.constant dense<0.000000e+00> : vector<8x128xf32>
    %27 = tpu.matmul %26, %15, %cst_14 {dimension_numbers = #tpu.dot_dimension_numbers<[1], [0], [0], [1], [0, 0, 1, 1], [], []>} : vector<8x128xbf16>, vector<128x128xbf16>, vector<8x128xf32> -> vector<8x128xf32>
    %28 = math.tanh %27 : vector<8x128xf32>
    %29 = arith.truncf %28 : vector<8x128xf32> to vector<8x128xbf16>
    %cst_15 = arith.constant dense<0.000000e+00> : vector<8x128xf32>
    %30 = tpu.matmul %29, %16, %cst_15 {dimension_numbers = #tpu.dot_dimension_numbers<[1], [0], [0], [1], [0, 0, 1, 1], [], []>} : vector<8x128xbf16>, vector<128x128xbf16>, vector<8x128xf32> -> vector<8x128xf32>
    %31 = math.tanh %30 : vector<8x128xf32>
    %32 = arith.truncf %31 : vector<8x128xf32> to vector<8x128xbf16>
    %cst_16 = arith.constant dense<0.000000e+00> : vector<8x128xf32>
    %33 = tpu.matmul %32, %17, %cst_16 {dimension_numbers = #tpu.dot_dimension_numbers<[1], [0], [0], [1], [0, 0, 1, 1], [], []>} : vector<8x128xbf16>, vector<128x128xbf16>, vector<8x128xf32> -> vector<8x128xf32>
    %34 = tpu.iota {dimensions = array<i32: 1>} : vector<8x128xi32>
    %c3_i32 = arith.constant 3 : i32
    %35 = vector.broadcast %c3_i32 : i32 to vector<8x128xi32>
    %36 = arith.cmpi slt, %34, %35 : vector<8x128xi32>
    %cst_17 = arith.constant -1.000000e+30 : f32
    %37 = vector.broadcast %cst_17 : f32 to vector<8x128xf32>
    %38 = arith.select %36, %33, %37 : vector<8x128xi1>, vector<8x128xf32>
    %cst_18 = arith.constant dense<0xFF800000> : vector<8xf32>
    %39 = vector.multi_reduction <maximumf>, %38, %cst_18 [1] : vector<8x128xf32> to vector<8xf32>
    %40 = vector.shape_cast %39 : vector<8xf32> to vector<8x1xf32>
    %41 = vector.broadcast %40 : vector<8x1xf32> to vector<8x128xf32>
    %42 = arith.subf %33, %41 : vector<8x128xf32>
    %43 = math.exp %42 : vector<8x128xf32>
    %cst_19 = arith.constant 0.000000e+00 : f32
    %44 = vector.broadcast %cst_19 : f32 to vector<8x128xf32>
    %45 = arith.select %36, %43, %44 : vector<8x128xi1>, vector<8x128xf32>
    %cst_20 = arith.constant dense<0.000000e+00> : vector<8xf32>
    %46 = vector.multi_reduction <add>, %45, %cst_20 [1] : vector<8x128xf32> to vector<8xf32>
    %47 = vector.shape_cast %46 : vector<8xf32> to vector<8x1xf32>
    %48 = math.log %47 : vector<8x1xf32>
    %49 = vector.broadcast %48 : vector<8x1xf32> to vector<8x128xf32>
    %50 = arith.subf %42, %49 : vector<8x128xf32>
    %c3_i32_21 = arith.constant 3 : i32
    %51 = vector.broadcast %c3_i32_21 : i32 to vector<8x128xi32>
    %52 = arith.cmpi eq, %34, %51 : vector<8x128xi32>
    %cst_22 = arith.constant 0.000000e+00 : f32
    %53 = vector.broadcast %cst_22 : f32 to vector<8x128xf32>
    %54 = arith.select %52, %33, %53 : vector<8x128xi1>, vector<8x128xf32>
    %55 = arith.select %36, %50, %54 : vector<8x128xi1>, vector<8x128xf32>
    %c0_23 = arith.constant 0 : index
    %c0_24 = arith.constant 0 : index
    %56 = vector.load %arg4[%c0_23, %c0_24] : memref<8x128xf32, #tpu.memory_space<vmem>>, vector<8x128xf32>
    tpu.vector_store %arg4[%c0_23, %c0_24], %55 {strides = array<i32>} : memref<8x128xf32, #tpu.memory_space<vmem>>, vector<8x128xf32>,
    return
  }
  func.func @transform_0(%arg0: i32) -> (i32, i32) {
    %c0_i32 = arith.constant 0 : i32
    %c0_i32_0 = arith.constant 0 : i32
    return %arg0, %c0_i32 : i32, i32
  }
  func.func @transform_1(%arg0: i32) -> (i32, i32) {
    %c0_i32 = arith.constant 0 : i32
    %c0_i32_0 = arith.constant 0 : i32
    %c0_i32_1 = arith.constant 0 : i32
    return %c0_i32, %c0_i32_0 : i32, i32
  }
  func.func @transform_2(%arg0: i32) -> (i32, i32) {
    %c0_i32 = arith.constant 0 : i32
    %c0_i32_0 = arith.constant 0 : i32
    %c0_i32_1 = arith.constant 0 : i32
    return %c0_i32, %c0_i32_0 : i32, i32
  }
  func.func @transform_3(%arg0: i32) -> (i32, i32) {
    %c0_i32 = arith.constant 0 : i32
    %c0_i32_0 = arith.constant 0 : i32
    return %arg0, %c0_i32 : i32, i32
  }
}

</mosaic_0001>

<bundles_post_ra>
// kernel: forward.1
= control target key start
LH: loop header
LB: loop body
LE: loop exit
PB: predicated region body
PF: predicated region fallthrough
CT: control target
= control target key end

     0   :  { %8 = vsyncpa [#allocation3], 0  ;;  %s2310_s0 = inlined_call_operand.vmem [shape: f32[8,256], index: 0, kind: input, shape index: {}]   ;;  %s2311_s1 = inlined_call_operand.hbm [shape: bf16[256,1024], index: 1, kind: input, shape index: {}]   ;;  %s2312_s2 = inlined_call_operand.hbm [shape: bf16[896,256], index: 2, kind: input, shape index: {}]   ;;  %s2313_s3 = inlined_call_operand.vmem [shape: f32[8,128], index: 3, kind: output, shape index: {}]  }
   0x1   :  { %9 = vsyncpa [#allocation5], 0  ;;  %s2204_s12 = smov [#allocation2]   ;;  %s2156_s16 = scalar_lea.hbm %s2311_s1, 16384 }
   0x2   :  { %s17_s13 = sshll.u32 %s2204_s12, 4  ;;  %p2157_p0 = scmp.ne.s32.totalorder %s2311_s1, %s2156_s16  ;;  %s18_s13 = int_to_ptr.vmem [resolvable:$true] %s17_s13 }
   0x3   :  { %p2160_p1 = scmp.lt.u32.totalorder %s2156_s16, %s2311_s1 }
   0x5   :  { %p2162_p2 = pnand %p2160_p1, %p2157_p0 }
   0x7   :  { %2165 = shalt.err (!%p2162_p2)
}
   0x8   :  { %s2166_s21 = scalar_lea.vmem %s18_s13, 16384  ;;  %p2171_p4 = scmp.lt.s32.totalorder %s18_s13, %s18_s13 }
   0x9   :  { %p2167_p3 = scmp.ne.s32.totalorder %s18_s13, %s2166_s21  ;;  %p2172_p5 = scmp.lt.s32.totalorder %s2166_s21, %s2166_s21 }
   0xb   :  { %p2173_p6 = por %p2172_p5, %p2171_p4 }
   0xd   :  { %p2174_p7 = pnand %p2173_p6, %p2167_p3 }
   0xf   :  { %2177 = shalt.err (!%p2174_p7)
}
  0x10   :  { %s2205_s22 = smov 512   ;;  %s2206_s23 = smov 32  }
  0x11   :  { %23 = dma.hbm_to_vmem [thread:$0]  %s2311_s1, 16384, %s18_s13, [#allocation3], %s2205_s22, %s2205_s22, %s2206_s23  }
  0x12   :  { %s2207_s26 = smov [#allocation4]   ;;  %s2178_s30 = scalar_lea.hbm %s2312_s2, 14336 }
  0x13   :  { %s29_s27 = sshll.u32 %s2207_s26, 4  ;;  %p2179_p8 = scmp.ne.s32.totalorder %s2312_s2, %s2178_s30  ;;  %s30_s27 = int_to_ptr.vmem [resolvable:$true] %s29_s27 }
  0x14   :  { %p2182_p9 = scmp.lt.u32.totalorder %s2178_s30, %s2312_s2 }
  0x16   :  { %p2184_p10 = pnand %p2182_p9, %p2179_p8 }
  0x18   :  { %2187 = shalt.err (!%p2184_p10)
}
  0x19   :  { %s2188_s8 = scalar_lea.vmem %s30_s27, 14336  ;;  %p2193_p12 = scmp.lt.s32.totalorder %s30_s27, %s30_s27 }
  0x1a   :  { %p2189_p11 = scmp.ne.s32.totalorder %s30_s27, %s2188_s8  ;;  %p2194_p13 = scmp.lt.s32.totalorder %s2188_s8, %s2188_s8 }
  0x1c   :  { %p2195_p0 = por %p2194_p13, %p2193_p12 }
  0x1e   :  { %p2196_p1 = pnand %p2195_p0, %p2189_p11 }
  0x20   :  { %2199 = shalt.err (!%p2196_p1)
}
  0x21   :  { %s2208_s1 = smov 128   ;;  %s2209_s9 = smov 8  }
  0x22   :  { %35 = dma.hbm_to_vmem [thread:$0]  %s2312_s2, 14336, %s30_s27, [#allocation5], %s2208_s1, %s2208_s1, %s2209_s9  }
  0x23   :  { %2200 = dma.done.wait [#allocation3], 16384  }
  0x24   :  { %2201 = vsyncadd [#allocation3], 4294950912 }
  0x25   :  { %2202 = dma.done.wait [#allocation5], 14336  }
  0x26   :  { %2203 = vsyncadd [#allocation5], 4294952960  ;;  %v47_v0 = vld [vmem:[#allocation2] sm:$0xff]  ;;  %v48_v2 = vld [vmem:[#allocation2 + $0x8] sm:$0xff]  ;;  %vm2211_vm0 = vmmov 0  }
  0x27   :  { %v51_v1 = vld [vmem:[#allocation2 + $0x20] sm:$0xff]  ;;  %v52_v4 = vld [vmem:[#allocation2 + $0x28] sm:$0xff] }
  0x28   :  { %v1744_v3 = vcombine.high %v47_v0, %v51_v1  ;;  %v1743_v5 = vcombine.low %v47_v0, %v51_v1  ;;  %v55_v6 = vld [vmem:[#allocation2 + $0x40] sm:$0xff]  ;;  %v1746_v8 = vcombine.high %v48_v2, %v52_v4  ;;  %v1745_v9 = vcombine.low %v48_v2, %v52_v4  ;;  %v56_v11 = vld [vmem:[#allocation2 + $0x48] sm:$0xff] }
  0x29   :  { %v59_v7 = vld [vmem:[#allocation2 + $0x60] sm:$0xff]  ;;  %v60_v12 = vld [vmem:[#allocation2 + $0x68] sm:$0xff] }
  0x2a   :  { %v1752_v10 = vcombine.high %v55_v6, %v59_v7  ;;  %v63_v13 = vld [vmem:[#allocation2 + $0x80] sm:$0xff]  ;;  %815 = vmatprep.subr.bf16.mxu0 %v1744_v3  ;;  %v1754_v14 = vcombine.high %v56_v11, %v60_v12  ;;  %v64_v16 = vld [vmem:[#allocation2 + $0x88] sm:$0xff]  ;;  %856 = vmatprep.subr.bf16.mxu1 %v1746_v8  ;;  %v1751_v18 = vcombine.low %v55_v6, %v59_v7 }
  0x2b   :  { %v67_v15 = vld [vmem:[#allocation2 + $0xa0] sm:$0xff]  ;;  %v68_v17 = vld [vmem:[#allocation2 + $0xa8] sm:$0xff]  ;;  %816 = vmatpush1.bf16.msra.mxu0 %v1743_v5  ;;  %857 = vmatpush1.bf16.msra.mxu1 %v1745_v9  ;;  %v1753_v19 = vcombine.low %v56_v11, %v60_v12 }
  0x2c   :  { %817 = vmatprep.subr.bf16.mxu0 %v1752_v10  ;;  %v1760_v20 = vcombine.high %v63_v13, %v67_v15  ;;  %858 = vmatprep.subr.bf16.mxu1 %v1754_v14  ;;  %v1762_v21 = vcombine.high %v64_v16, %v68_v17  ;;  %v71_v22 = vld [vmem:[#allocation2 + $0xc0] sm:$0xff]  ;;  %v72_v24 = vld [vmem:[#allocation2 + $0xc8] sm:$0xff]  ;;  %v1759_v26 = vcombine.low %v63_v13, %v67_v15 }
  0x2d   :  { %v75_v23 = vld [vmem:[#allocation2 + $0xe0] sm:$0xff]  ;;  %v76_v25 = vld [vmem:[#allocation2 + $0xe8] sm:$0xff]  ;;  %v1761_v27 = vcombine.low %v64_v16, %v68_v17 }
  0x2e   :  { %v1768_v28 = vcombine.high %v71_v22, %v75_v23  ;;  %v1770_v29 = vcombine.high %v72_v24, %v76_v25  ;;  %v79_v30 = vld [vmem:[#allocation2 + $0x100] sm:$0xff]  ;;  %v80_v32 = vld [vmem:[#allocation2 + $0x108] sm:$0xff]  ;;  %v1767_v34 = vcombine.low %v71_v22, %v75_v23  ;;  %v1769_v35 = vcombine.low %v72_v24, %v76_v25 }
  0x2f   :  { %818 = vmatpush1.bf16.msra.mxu0 %v1751_v18  ;;  %859 = vmatpush1.bf16.msra.mxu1 %v1753_v19  ;;  %v83_v31 = vld [vmem:[#allocation2 + $0x120] sm:$0xff]  ;;  %v84_v33 = vld [vmem:[#allocation2 + $0x128] sm:$0xff] }
  0x30   :  { %819 = vmatprep.subr.bf16.mxu0 %v1760_v20  ;;  %860 = vmatprep.subr.bf16.mxu1 %v1762_v21  ;;  %v1776_v36 = vcombine.high %v79_v30, %v83_v31  ;;  %v1778_v37 = vcombine.high %v80_v32, %v84_v33  ;;  %v87_v38 = vld [vmem:[#allocation2 + $0x140] sm:$0xff]  ;;  %v88_v40 = vld [vmem:[#allocation2 + $0x148] sm:$0xff]  ;;  %v1775_v42 = vcombine.low %v79_v30, %v83_v31 }
  0x31   :  { %v91_v39 = vld [vmem:[#allocation2 + $0x160] sm:$0xff]  ;;  %v92_v41 = vld [vmem:[#allocation2 + $0x168] sm:$0xff]  ;;  %v1777_v43 = vcombine.low %v80_v32, %v84_v33 }
  0x32   :  { %v1784_v44 = vcombine.high %v87_v38, %v91_v39  ;;  %v1786_v45 = vcombine.high %v88_v40, %v92_v41  ;;  %v95_v46 = vld [vmem:[#allocation2 + $0x180] sm:$0xff]  ;;  %v96_v48 = vld [vmem:[#allocation2 + $0x188] sm:$0xff]  ;;  %v1783_v50 = vcombine.low %v87_v38, %v91_v39  ;;  %v1785_v51 = vcombine.low %v88_v40, %v92_v41 }
  0x33   :  { %820 = vmatpush1.bf16.msra.mxu0 %v1759_v26  ;;  %861 = vmatpush1.bf16.msra.mxu1 %v1761_v27  ;;  %v99_v47 = vld [vmem:[#allocation2 + $0x1a0] sm:$0xff]  ;;  %v100_v49 = vld [vmem:[#allocation2 + $0x1a8] sm:$0xff] }
  0x34   :  { %821 = vmatprep.subr.bf16.mxu0 %v1768_v28  ;;  %862 = vmatprep.subr.bf16.mxu1 %v1770_v29  ;;  %v1792_v52 = vcombine.high %v95_v46, %v99_v47  ;;  %v44_v53 = vld [vmem:[%s2310_s0 + $0x8] sm:$0xff]  ;;  %v1794_v54 = vcombine.high %v96_v48, %v100_v49  ;;  %v103_v55 = vld [vmem:[#allocation2 + $0x1c0] sm:$0xff]  ;;  %v1791_v60 = vcombine.low %v95_v46, %v99_v47 }
  0x35   :  { %v107_v56 = vld [vmem:[#allocation2 + $0x1e0] sm:$0xff]  ;;  %v2259_v57 = vpack.c.bf16 %v44_v53, %v44_v53  ;;  %v104_v58 = vld [vmem:[#allocation2 + $0x1c8] sm:$0xff]  ;;  %v1793_v61 = vcombine.low %v96_v48, %v100_v49 }
  0x36   :  { %v108_v59 = vld [vmem:[#allocation2 + $0x1e8] sm:$0xff]  ;;  %v1800_v62 = vcombine.high %v103_v55, %v107_v56  ;;  %v111_v0 = vld [vmem:[#allocation2 + $0x200] sm:$0xff]  ;;  %v1799_v4 = vcombine.low %v103_v55, %v107_v56 }
  0x37   :  { %822 = vmatpush1.bf16.msra.mxu0 %v1767_v34  ;;  %863 = vmatpush1.bf16.msra.mxu1 %v1769_v35  ;;  %v1802_v63 = vcombine.high %v104_v58, %v108_v59  ;;  %v115_v1 = vld [vmem:[#allocation2 + $0x220] sm:$0xff]  ;;  %v112_v2 = vld [vmem:[#allocation2 + $0x208] sm:$0xff]  ;;  %v1801_v5 = vcombine.low %v104_v58, %v108_v59 }
  0x38   :  { %823 = vmatprep.subr.bf16.mxu0 %v1776_v36  ;;  %864 = vmatprep.subr.bf16.mxu1 %v1778_v37  ;;  %v116_v3 = vld [vmem:[#allocation2 + $0x228] sm:$0xff]  ;;  %v1808_v6 = vcombine.high %v111_v0, %v115_v1  ;;  %v119_v8 = vld [vmem:[#allocation2 + $0x240] sm:$0xff]  ;;  %v1807_v12 = vcombine.low %v111_v0, %v115_v1 }
  0x39   :  { %847 = vmatprep.mubr.bf16.mxu0 %v2259_v57  ;;  %888 = vmatprep.mubr.bf16.mxu1 %v2259_v57  ;;  %v1810_v7 = vcombine.high %v112_v2, %v116_v3  ;;  %v123_v9 = vld [vmem:[#allocation2 + $0x260] sm:$0xff]  ;;  %v120_v10 = vld [vmem:[#allocation2 + $0x248] sm:$0xff]  ;;  %v1809_v13 = vcombine.low %v112_v2, %v116_v3  ;;  %v50_v2 = vld [vmem:[#allocation2 + $0x18] sm:$0xff] }
  0x3a   :  { %v124_v11 = vld [vmem:[#allocation2 + $0x268] sm:$0xff]  ;;  %v1816_v14 = vcombine.high %v119_v8, %v123_v9  ;;  %v127_v16 = vld [vmem:[#allocation2 + $0x280] sm:$0xff]  ;;  %v1815_v20 = vcombine.low %v119_v8, %v123_v9  ;;  %v54_v3 = vld [vmem:[#allocation2 + $0x38] sm:$0xff] }
  0x3b   :  { %824 = vmatpush1.bf16.msra.mxu0 %v1775_v42  ;;  %865 = vmatpush1.bf16.msra.mxu1 %v1777_v43  ;;  %v1818_v15 = vcombine.high %v120_v10, %v124_v11  ;;  %v131_v17 = vld [vmem:[#allocation2 + $0x2a0] sm:$0xff]  ;;  %v128_v18 = vld [vmem:[#allocation2 + $0x288] sm:$0xff]  ;;  %v1817_v21 = vcombine.low %v120_v10, %v124_v11  ;;  %v61_v8 = vld [vmem:[#allocation2 + $0x70] sm:$0xff] }
  0x3c   :  { %825 = vmatprep.subr.bf16.mxu0 %v1784_v44  ;;  %866 = vmatprep.subr.bf16.mxu1 %v1786_v45  ;;  %v132_v19 = vld [vmem:[#allocation2 + $0x2a8] sm:$0xff]  ;;  %v1824_v22 = vcombine.high %v127_v16, %v131_v17  ;;  %v135_v24 = vld [vmem:[#allocation2 + $0x2c0] sm:$0xff]  ;;  %v1823_v28 = vcombine.low %v127_v16, %v131_v17  ;;  %v58_v11 = vld [vmem:[#allocation2 + $0x58] sm:$0xff] }
  0x3d   :  { %v1826_v23 = vcombine.high %v128_v18, %v132_v19  ;;  %v139_v25 = vld [vmem:[#allocation2 + $0x2e0] sm:$0xff]  ;;  %v136_v26 = vld [vmem:[#allocation2 + $0x2c8] sm:$0xff]  ;;  %v1825_v29 = vcombine.low %v128_v18, %v132_v19  ;;  %v65_v16 = vld [vmem:[#allocation2 + $0x90] sm:$0xff]  ;;  %v1749_v18 = vcombine.low %v50_v2, %v54_v3 }
  0x3e   :  { %v140_v27 = vld [vmem:[#allocation2 + $0x2e8] sm:$0xff]  ;;  %v1832_v30 = vcombine.high %v135_v24, %v139_v25  ;;  %v143_v32 = vld [vmem:[#allocation2 + $0x300] sm:$0xff]  ;;  %v1831_v36 = vcombine.low %v135_v24, %v139_v25  ;;  %v69_v17 = vld [vmem:[#allocation2 + $0xb0] sm:$0xff] }
  0x3f   :  { %826 = vmatpush1.bf16.msra.mxu0 %v1783_v50  ;;  %867 = vmatpush1.bf16.msra.mxu1 %v1785_v51  ;;  %v1834_v31 = vcombine.high %v136_v26, %v140_v27  ;;  %v147_v33 = vld [vmem:[#allocation2 + $0x320] sm:$0xff]  ;;  %v144_v34 = vld [vmem:[#allocation2 + $0x308] sm:$0xff]  ;;  %v1833_v39 = vcombine.low %v136_v26, %v140_v27  ;;  %v73_v24 = vld [vmem:[#allocation2 + $0xd0] sm:$0xff]  ;;  %v1764_v27 = vcombine.high %v65_v16, %v69_v17 }
  0x40   :  { %827 = vmatprep.subr.bf16.mxu0 %v1792_v52  ;;  %868 = vmatprep.subr.bf16.mxu1 %v1794_v54  ;;  %v148_v35 = vld [vmem:[#allocation2 + $0x328] sm:$0xff]  ;;  %v151_v37 = vld [vmem:[#allocation2 + $0x340] sm:$0xff]  ;;  %v1840_v40 = vcombine.high %v143_v32, %v147_v33  ;;  %v1839_v44 = vcombine.low %v143_v32, %v147_v33  ;;  %v77_v25 = vld [vmem:[#allocation2 + $0xf0] sm:$0xff] }
  0x41   :  { %v155_v38 = vld [vmem:[#allocation2 + $0x360] sm:$0xff]  ;;  %v152_v41 = vld [vmem:[#allocation2 + $0x348] sm:$0xff]  ;;  %v1842_v43 = vcombine.high %v144_v34, %v148_v35  ;;  %v1841_v47 = vcombine.low %v144_v34, %v148_v35  ;;  %v81_v32 = vld [vmem:[#allocation2 + $0x110] sm:$0xff]  ;;  %v1772_v35 = vcombine.high %v73_v24, %v77_v25 }
  0x42   :  { %v156_v42 = vld [vmem:[#allocation2 + $0x368] sm:$0xff]  ;;  %v159_v45 = vld [vmem:[#allocation2 + $0x380] sm:$0xff]  ;;  %v1848_v48 = vcombine.high %v151_v37, %v155_v38  ;;  %v1847_v52 = vcombine.low %v151_v37, %v155_v38  ;;  %v85_v33 = vld [vmem:[#allocation2 + $0x130] sm:$0xff] }
  0x43   :  { %828 = vmatpush1.bf16.msra.mxu0 %v1791_v60  ;;  %869 = vmatpush1.bf16.msra.mxu1 %v1793_v61  ;;  %v163_v46 = vld [vmem:[#allocation2 + $0x3a0] sm:$0xff]  ;;  %v160_v49 = vld [vmem:[#allocation2 + $0x388] sm:$0xff]  ;;  %v1850_v51 = vcombine.high %v152_v41, %v156_v42  ;;  %v1849_v55 = vcombine.low %v152_v41, %v156_v42  ;;  %v86_v37 = vld [vmem:[#allocation2 + $0x138] sm:$0xff] }
  0x44   :  { %829 = vmatprep.subr.bf16.mxu0 %v1800_v62  ;;  %870 = vmatprep.subr.bf16.mxu1 %v1802_v63  ;;  %v164_v50 = vld [vmem:[#allocation2 + $0x3a8] sm:$0xff]  ;;  %v167_v53 = vld [vmem:[#allocation2 + $0x3c0] sm:$0xff]  ;;  %v1856_v56 = vcombine.high %v159_v45, %v163_v46  ;;  %v1855_v61 = vcombine.low %v159_v45, %v163_v46  ;;  %v49_v62 = vld [vmem:[#allocation2 + $0x10] sm:$0xff]  ;;  %v1779_v46 = vcombine.low %v81_v32, %v85_v33 }
  0x45   :  { %v171_v54 = vld [vmem:[#allocation2 + $0x3e0] sm:$0xff]  ;;  %v168_v58 = vld [vmem:[#allocation2 + $0x3c8] sm:$0xff]  ;;  %v1858_v60 = vcombine.high %v160_v49, %v164_v50  ;;  %v53_v63 = vld [vmem:[#allocation2 + $0x30] sm:$0xff]  ;;  %v1857_v0 = vcombine.low %v160_v49, %v164_v50 }
  0x46   :  { %v172_v59 = vld [vmem:[#allocation2 + $0x3e8] sm:$0xff]  ;;  %v1864_v1 = vcombine.high %v167_v53, %v171_v54  ;;  %v1748_v10 = vcombine.high %v49_v62, %v53_v63  ;;  %v93_v41 = vld [vmem:[#allocation2 + $0x170] sm:$0xff] }
  0x47   :  { %830 = vmatpush1.bf16.msra.mxu0 %v1799_v4  ;;  %871 = vmatpush1.bf16.msra.mxu1 %v1801_v5  ;;  %v1866_v4 = vcombine.high %v168_v58, %v172_v59  ;;  %v43_v5 = vld [vmem:[%s2310_s0] sm:$0xff]  ;;  %v1865_v9 = vcombine.low %v168_v58, %v172_v59  ;;  %v97_v50 = vld [vmem:[#allocation2 + $0x190] sm:$0xff] }
  0x48   :  { %831 = vmatprep.subr.bf16.mxu0 %v1808_v6  ;;  %872 = vmatprep.subr.bf16.mxu1 %v1810_v7  ;;  %v1863_v6 = vcombine.low %v167_v53, %v171_v54  ;;  %v57_v7 = vld [vmem:[#allocation2 + $0x50] sm:$0xff]  ;;  %v102_v53 = vld [vmem:[#allocation2 + $0x1b8] sm:$0xff] }
  0x49   :  { %v1756_v19 = vcombine.high %v57_v7, %v61_v8  ;;  %v105_v59 = vld [vmem:[#allocation2 + $0x1d0] sm:$0xff] }
  0x4b   :  { %832 = vmatpush1.bf16.msra.mxu0 %v1807_v12  ;;  %873 = vmatpush1.bf16.msra.mxu1 %v1809_v13  ;;  %v62_v12 = vld [vmem:[#allocation2 + $0x78] sm:$0xff]  ;;  %v1750_v13 = vcombine.high %v50_v2, %v54_v3  ;;  %v113_v3 = vld [vmem:[#allocation2 + $0x210] sm:$0xff] }
  0x4c   :  { %833 = vmatprep.subr.bf16.mxu0 %v1816_v14  ;;  %874 = vmatprep.subr.bf16.mxu1 %v1818_v15  ;;  %v2266_v14 = vpack.c.bf16 %v43_v5, %v43_v5  ;;  %v1747_v15 = vcombine.low %v49_v62, %v53_v63  ;;  %v1757_v26 = vcombine.low %v58_v11, %v62_v12  ;;  %v110_v62 = vld [vmem:[#allocation2 + $0x1f8] sm:$0xff] }
  0x4d   :  { %v114_v5 = vld [vmem:[#allocation2 + $0x218] sm:$0xff] }
  0x4f   :  { %834 = vmatpush1.bf16.msra.mxu0 %v1815_v20  ;;  %875 = vmatpush1.bf16.msra.mxu1 %v1817_v21  ;;  %v66_v20 = vld [vmem:[#allocation2 + $0x98] sm:$0xff] }
  0x50   :  { %835 = vmatprep.subr.bf16.mxu0 %v1824_v22  ;;  %876 = vmatprep.subr.bf16.mxu1 %v1826_v23  ;;  %v70_v21 = vld [vmem:[#allocation2 + $0xb8] sm:$0xff]  ;;  %v1758_v22 = vcombine.high %v58_v11, %v62_v12  ;;  %v1755_v23 = vcombine.low %v57_v7, %v61_v8  ;;  %v121_v11 = vld [vmem:[#allocation2 + $0x250] sm:$0xff] }
  0x51   :  { %v1765_v34 = vcombine.low %v66_v20, %v70_v21  ;;  %v125_v12 = vld [vmem:[#allocation2 + $0x270] sm:$0xff] }
  0x53   :  { %836 = vmatpush1.bf16.msra.mxu0 %v1823_v28  ;;  %877 = vmatpush1.bf16.msra.mxu1 %v1825_v29  ;;  %v74_v28 = vld [vmem:[#allocation2 + $0xd8] sm:$0xff] }
  0x54   :  { %837 = vmatprep.subr.bf16.mxu0 %v1832_v30  ;;  %878 = vmatprep.subr.bf16.mxu1 %v1834_v31  ;;  %v78_v29 = vld [vmem:[#allocation2 + $0xf8] sm:$0xff]  ;;  %v1766_v30 = vcombine.high %v66_v20, %v70_v21  ;;  %v1763_v31 = vcombine.low %v65_v16, %v69_v17  ;;  %v129_v20 = vld [vmem:[#allocation2 + $0x290] sm:$0xff] }
  0x55   :  { %v1774_v38 = vcombine.high %v74_v28, %v78_v29  ;;  %v1773_v42 = vcombine.low %v74_v28, %v78_v29  ;;  %v133_v21 = vld [vmem:[#allocation2 + $0x2b0] sm:$0xff] }
  0x56   :  { %v137_v28 = vld [vmem:[#allocation2 + $0x2d0] sm:$0xff] }
  0x57   :  { %838 = vmatpush1.bf16.msra.mxu0 %v1831_v36  ;;  %879 = vmatpush1.bf16.msra.mxu1 %v1833_v39  ;;  %v82_v36 = vld [vmem:[#allocation2 + $0x118] sm:$0xff]  ;;  %v1771_v39 = vcombine.low %v73_v24, %v77_v25  ;;  %v1819_v24 = vcombine.low %v121_v11, %v125_v12  ;;  %v141_v29 = vld [vmem:[#allocation2 + $0x2f0] sm:$0xff] }
  0x58   :  { %839 = vmatprep.subr.bf16.mxu0 %v1840_v40  ;;  %880 = vmatprep.subr.bf16.mxu1 %v1842_v43  ;;  %v89_v40 = vld [vmem:[#allocation2 + $0x150] sm:$0xff]  ;;  %v90_v43 = vld [vmem:[#allocation2 + $0x158] sm:$0xff]  ;;  %v1782_v45 = vcombine.high %v82_v36, %v86_v37 }
  0x59   :  { %v1787_v54 = vcombine.low %v89_v40, %v93_v41 }
  0x5b   :  { %840 = vmatpush1.bf16.msra.mxu0 %v1839_v44  ;;  %881 = vmatpush1.bf16.msra.mxu1 %v1841_v47  ;;  %v94_v44 = vld [vmem:[#allocation2 + $0x178] sm:$0xff]  ;;  %v1781_v47 = vcombine.low %v82_v36, %v86_v37  ;;  %v145_v36 = vld [vmem:[#allocation2 + $0x310] sm:$0xff] }
  0x5c   :  { %841 = vmatprep.subr.bf16.mxu0 %v1848_v48  ;;  %882 = vmatprep.subr.bf16.mxu1 %v1850_v51  ;;  %v1788_v48 = vcombine.high %v89_v40, %v93_v41  ;;  %v1790_v49 = vcombine.high %v90_v43, %v94_v44  ;;  %v101_v51 = vld [vmem:[#allocation2 + $0x1b0] sm:$0xff]  ;;  %v1835_v40 = vcombine.low %v137_v28, %v141_v29 }
  0x5d   :  { %v1795_v63 = vcombine.low %v97_v50, %v101_v51  ;;  %v149_v37 = vld [vmem:[#allocation2 + $0x330] sm:$0xff] }
  0x5f   :  { %842 = vmatpush1.bf16.msra.mxu0 %v1847_v52  ;;  %883 = vmatpush1.bf16.msra.mxu1 %v1849_v55  ;;  %v98_v52 = vld [vmem:[#allocation2 + $0x198] sm:$0xff]  ;;  %v1789_v55 = vcombine.low %v90_v43, %v94_v44  ;;  %v153_v43 = vld [vmem:[#allocation2 + $0x350] sm:$0xff] }
  0x60   :  { %843 = vmatprep.subr.bf16.mxu0 %v1856_v56  ;;  %884 = vmatprep.subr.bf16.mxu1 %v1858_v60  ;;  %v1796_v56 = vcombine.high %v97_v50, %v101_v51  ;;  %v1798_v58 = vcombine.high %v98_v52, %v102_v53  ;;  %v109_v60 = vld [vmem:[#allocation2 + $0x1f0] sm:$0xff] }
  0x61   :  { %v1803_v7 = vcombine.low %v105_v59, %v109_v60  ;;  %v157_v44 = vld [vmem:[#allocation2 + $0x370] sm:$0xff] }
  0x62   :  { %v161_v51 = vld [vmem:[#allocation2 + $0x390] sm:$0xff] }
  0x63   :  { %844 = vmatpush1.bf16.msra.mxu0 %v1855_v61  ;;  %885 = vmatpush1.bf16.msra.mxu1 %v1857_v0  ;;  %v106_v61 = vld [vmem:[#allocation2 + $0x1d8] sm:$0xff]  ;;  %v1797_v0 = vcombine.low %v98_v52, %v102_v53  ;;  %v165_v52 = vld [vmem:[#allocation2 + $0x3b0] sm:$0xff] }
  0x64   :  { %845 = vmatprep.subr.bf16.mxu0 %v1864_v1  ;;  %886 = vmatprep.subr.bf16.mxu1 %v1866_v4  ;;  %v1804_v1 = vcombine.high %v105_v59, %v109_v60  ;;  %v1806_v2 = vcombine.high %v106_v61, %v110_v62  ;;  %v117_v4 = vld [vmem:[#allocation2 + $0x230] sm:$0xff]  ;;  %v1805_v8 = vcombine.low %v106_v61, %v110_v62  ;;  %v162_v53 = vld [vmem:[#allocation2 + $0x398] sm:$0xff] }
  0x65   :  { %v1811_v16 = vcombine.low %v113_v3, %v117_v4  ;;  %v169_v60 = vld [vmem:[#allocation2 + $0x3d0] sm:$0xff]  ;;  %v170_v62 = vld [vmem:[#allocation2 + $0x3d8] sm:$0xff] }
  0x66   :  { %v173_v61 = vld [vmem:[#allocation2 + $0x3f0] sm:$0xff] }
  0x67   :  { %846 = vmatpush1.bf16.msra.mxu0 %v1863_v6  ;;  %887 = vmatpush1.bf16.msra.mxu1 %v1865_v9  ;;  %v118_v6 = vld [vmem:[#allocation2 + $0x238] sm:$0xff]  ;;  %v1812_v9 = vcombine.high %v113_v3, %v117_v4  ;;  %v1867_v4 = vcombine.low %v169_v60, %v173_v61 }
  0x68   :  { %897 = vmatprep.subr.bf16.mxu0 %v1748_v10  ;;  %938 = vmatprep.subr.bf16.mxu1 %v1750_v13  ;;  %v1814_v10 = vcombine.high %v114_v5, %v118_v6  ;;  %v122_v13 = vld [vmem:[#allocation2 + $0x258] sm:$0xff]  ;;  %v1813_v17 = vcombine.low %v114_v5, %v118_v6  ;;  %v2060_v6 = vld [vmem:[#allocation4] ss:$8 sps:$4 sm:$0xff]  }
  0x6a   :  { %848 = vmatmul.mubr.bf16.vlgmr.msra.gmra.mrb[0].mxu0 %v2266_v14  ;;  %889 = vmatmul.mubr.bf16.vlgmr.msra.gmra.mrb[0].mxu1 %v2266_v14 }
  0x6b   :  { %898 = vmatpush1.bf16.msra.mxu0 %v1747_v15  ;;  %939 = vmatpush1.bf16.msra.mxu1 %v1749_v18  ;;  %v126_v15 = vld [vmem:[#allocation2 + $0x278] sm:$0xff]  ;;  %v1820_v18 = vcombine.high %v121_v11, %v125_v12  ;;  %v2066_v11 = vld [vmem:[#allocation4 + $0x20] ss:$8 sps:$4 sm:$0xff]  }
  0x6c   :  { %899 = vmatprep.subr.bf16.mxu0 %v1756_v19  ;;  %940 = vmatprep.subr.bf16.mxu1 %v1758_v22  ;;  %v1822_v19 = vcombine.high %v122_v13, %v126_v15  ;;  %v130_v22 = vld [vmem:[#allocation2 + $0x298] sm:$0xff]  ;;  %v1821_v25 = vcombine.low %v122_v13, %v126_v15  ;;  %v2074_v15 = vld [vmem:[#allocation4 + $0x44] ss:$8 sps:$4 sm:$0xff]  }
  0x6d   :  { %929 = vmatprep.mubr.bf16.mxu0 %v2259_v57  ;;  %970 = vmatprep.mubr.bf16.mxu1 %v2259_v57  ;;  %v1780_v57 = vcombine.high %v81_v32, %v85_v33  ;;  %v1827_v32 = vcombine.low %v129_v20, %v133_v21  ;;  %v2071_v12 = vld [vmem:[#allocation4 + $0x34] ss:$8 sps:$4 sm:$0xff]   ;;  %v2069_v13 = vld [vmem:[#allocation4 + $0x30] ss:$8 sps:$4 sm:$0xff]  }
  0x6f   :  { %900 = vmatpush1.bf16.msra.mxu0 %v1755_v23  ;;  %941 = vmatpush1.bf16.msra.mxu1 %v1757_v26  ;;  %v134_v23 = vld [vmem:[#allocation2 + $0x2b8] sm:$0xff]  ;;  %v1828_v26 = vcombine.high %v129_v20, %v133_v21 }
  0x70   :  { %901 = vmatprep.subr.bf16.mxu0 %v1764_v27  ;;  %942 = vmatprep.subr.bf16.mxu1 %v1766_v30  ;;  %v1830_v27 = vcombine.high %v130_v22, %v134_v23  ;;  %v138_v30 = vld [vmem:[#allocation2 + $0x2d8] sm:$0xff]  ;;  %v1829_v33 = vcombine.low %v130_v22, %v134_v23  ;;  %v2086_v22 = vld [vmem:[#allocation4 + $0x84] ss:$8 sps:$4 sm:$0xff]   ;;  %v2084_v23 = vld [vmem:[#allocation4 + $0x80] ss:$8 sps:$4 sm:$0xff]  }
  0x71   :  { %v2083_v20 = vld [vmem:[#allocation4 + $0x74] ss:$8 sps:$4 sm:$0xff]   ;;  %v2081_v21 = vld [vmem:[#allocation4 + $0x70] ss:$8 sps:$4 sm:$0xff]  }
  0x73   :  { %902 = vmatpush1.bf16.msra.mxu0 %v1763_v31  ;;  %943 = vmatpush1.bf16.msra.mxu1 %v1765_v34  ;;  %v142_v31 = vld [vmem:[#allocation2 + $0x2f8] sm:$0xff]  ;;  %v1836_v34 = vcombine.high %v137_v28, %v141_v29 }
  0x74   :  { %903 = vmatprep.subr.bf16.mxu0 %v1772_v35  ;;  %944 = vmatprep.subr.bf16.mxu1 %v1774_v38  ;;  %v1838_v35 = vcombine.high %v138_v30, %v142_v31  ;;  %v146_v38 = vld [vmem:[#allocation2 + $0x318] sm:$0xff]  ;;  %v1837_v41 = vcombine.low %v138_v30, %v142_v31  ;;  %v2098_v30 = vld [vmem:[#allocation4 + $0xc4] ss:$8 sps:$4 sm:$0xff]   ;;  %v2096_v31 = vld [vmem:[#allocation4 + $0xc0] ss:$8 sps:$4 sm:$0xff]  }
  0x75   :  { %v2095_v28 = vld [vmem:[#allocation4 + $0xb4] ss:$8 sps:$4 sm:$0xff]   ;;  %v2093_v29 = vld [vmem:[#allocation4 + $0xb0] ss:$8 sps:$4 sm:$0xff]  }
  0x77   :  { %904 = vmatpush1.bf16.msra.mxu0 %v1771_v39  ;;  %945 = vmatpush1.bf16.msra.mxu1 %v1773_v42  ;;  %v150_v39 = vld [vmem:[#allocation2 + $0x338] sm:$0xff]  ;;  %v1844_v42 = vcombine.high %v145_v36, %v149_v37 }
  0x78   :  { %905 = vmatprep.subr.bf16.mxu0 %v1780_v57  ;;  %946 = vmatprep.subr.bf16.mxu1 %v1782_v45  ;;  %v1846_v57 = vcombine.high %v146_v38, %v150_v39  ;;  %v154_v45 = vld [vmem:[#allocation2 + $0x358] sm:$0xff] }
  0x7b   :  { %906 = vmatpush1.bf16.msra.mxu0 %v1779_v46  ;;  %947 = vmatpush1.bf16.msra.mxu1 %v1781_v47  ;;  %v158_v46 = vld [vmem:[#allocation2 + $0x378] sm:$0xff]  ;;  %v1843_v47 = vcombine.low %v145_v36, %v149_v37 }
  0x7c   :  { %907 = vmatprep.subr.bf16.mxu0 %v1788_v48  ;;  %948 = vmatprep.subr.bf16.mxu1 %v1790_v49  ;;  %v1845_v48 = vcombine.low %v146_v38, %v150_v39  ;;  %v1852_v49 = vcombine.high %v153_v43, %v157_v44  ;;  %v1854_v50 = vcombine.high %v154_v45, %v158_v46  ;;  %v2107_v36 = vld [vmem:[#allocation4 + $0xf4] ss:$8 sps:$4 sm:$0xff]   ;;  %v2105_v37 = vld [vmem:[#allocation4 + $0xf0] ss:$8 sps:$4 sm:$0xff]   ;;  %v2108_v38 = vld [vmem:[#allocation4 + $0x180] ss:$8 sps:$4 sm:$0xff]  }
  0x7d   :  { %v2109_v39 = vld [vmem:[#allocation4 + $0x100] ss:$8 sps:$4 sm:$0xff]  }
  0x7f   :  { %908 = vmatpush1.bf16.msra.mxu0 %v1787_v54  ;;  %949 = vmatpush1.bf16.msra.mxu1 %v1789_v55  ;;  %v166_v54 = vld [vmem:[#allocation2 + $0x3b8] sm:$0xff]  ;;  %v1851_v55 = vcombine.low %v153_v43, %v157_v44 }
  0x80   :  { %909 = vmatprep.subr.bf16.mxu0 %v1796_v56  ;;  %950 = vmatprep.subr.bf16.mxu1 %v1798_v58  ;;  %v1853_v56 = vcombine.low %v154_v45, %v158_v46  ;;  %v1860_v58 = vcombine.high %v161_v51, %v165_v52  ;;  %v1862_v59 = vcombine.high %v162_v53, %v166_v54  ;;  %v2114_v43 = vld [vmem:[#allocation4 + $0x1b0] ss:$8 sps:$4 sm:$0xff]   ;;  %v2116_v45 = vld [vmem:[#allocation4 + $0x1c0] ss:$8 sps:$4 sm:$0xff]  }
  0x81   :  { %v2115_v44 = vld [vmem:[#allocation4 + $0x130] ss:$8 sps:$4 sm:$0xff]   ;;  %v2117_v46 = vld [vmem:[#allocation4 + $0x140] ss:$8 sps:$4 sm:$0xff]  }
  0x83   :  { %910 = vmatpush1.bf16.msra.mxu0 %v1795_v63  ;;  %951 = vmatpush1.bf16.msra.mxu1 %v1797_v0  ;;  %v174_v63 = vld [vmem:[#allocation2 + $0x3f8] sm:$0xff]  ;;  %v1859_v0 = vcombine.low %v161_v51, %v165_v52 }
  0x84   :  { %911 = vmatprep.subr.bf16.mxu0 %v1804_v1  ;;  %952 = vmatprep.subr.bf16.mxu1 %v1806_v2  ;;  %v1861_v1 = vcombine.low %v162_v53, %v166_v54  ;;  %v1868_v2 = vcombine.high %v169_v60, %v173_v61  ;;  %v1870_v3 = vcombine.high %v170_v62, %v174_v63 }
  0x85   :  { %v1869_v5 = vcombine.low %v170_v62, %v174_v63 }
  0x87   :  { %912 = vmatpush1.bf16.msra.mxu0 %v1803_v7  ;;  %953 = vmatpush1.bf16.msra.mxu1 %v1805_v8  ;;  %v2062_v7 = vld [vmem:[#allocation4 + $0x4] ss:$8 sps:$4 sm:$0xff]   ;;  %v2065_v8 = vld [vmem:[#allocation4 + $0x14] ss:$8 sps:$4 sm:$0xff]  }
  0x88   :  { %913 = vmatprep.subr.bf16.mxu0 %v1812_v9  ;;  %954 = vmatprep.subr.bf16.mxu1 %v1814_v10  ;;  %v2063_v9 = vld [vmem:[#allocation4 + $0x10] ss:$8 sps:$4 sm:$0xff]   ;;  %v2068_v10 = vld [vmem:[#allocation4 + $0x24] ss:$8 sps:$4 sm:$0xff]  }
  0x8b   :  { %914 = vmatpush1.bf16.msra.mxu0 %v1811_v16  ;;  %955 = vmatpush1.bf16.msra.mxu1 %v1813_v17  ;;  %v2072_v16 = vld [vmem:[#allocation4 + $0x40] ss:$8 sps:$4 sm:$0xff]   ;;  %v2075_v17 = vld [vmem:[#allocation4 + $0x50] ss:$8 sps:$4 sm:$0xff]  }
  0x8c   :  { %915 = vmatprep.subr.bf16.mxu0 %v1820_v18  ;;  %956 = vmatprep.subr.bf16.mxu1 %v1822_v19  ;;  %v2080_v18 = vld [vmem:[#allocation4 + $0x64] ss:$8 sps:$4 sm:$0xff]   ;;  %v2078_v19 = vld [vmem:[#allocation4 + $0x60] ss:$8 sps:$4 sm:$0xff]  }
  0x8f   :  { %916 = vmatpush1.bf16.msra.mxu0 %v1819_v24  ;;  %957 = vmatpush1.bf16.msra.mxu1 %v1821_v25  ;;  %v2089_v24 = vld [vmem:[#allocation4 + $0x94] ss:$8 sps:$4 sm:$0xff]   ;;  %v2087_v25 = vld [vmem:[#allocation4 + $0x90] ss:$8 sps:$4 sm:$0xff]  }
  0x90   :  { %917 = vmatprep.subr.bf16.mxu0 %v1828_v26  ;;  %958 = vmatprep.subr.bf16.mxu1 %v1830_v27  ;;  %v2092_v26 = vld [vmem:[#allocation4 + $0xa4] ss:$8 sps:$4 sm:$0xff]   ;;  %v2090_v27 = vld [vmem:[#allocation4 + $0xa0] ss:$8 sps:$4 sm:$0xff]  }
  0x93   :  { %918 = vmatpush1.bf16.msra.mxu0 %v1827_v32  ;;  %959 = vmatpush1.bf16.msra.mxu1 %v1829_v33  ;;  %v2101_v32 = vld [vmem:[#allocation4 + $0xd4] ss:$8 sps:$4 sm:$0xff]   ;;  %v2099_v33 = vld [vmem:[#allocation4 + $0xd0] ss:$8 sps:$4 sm:$0xff]  }
  0x94   :  { %919 = vmatprep.subr.bf16.mxu0 %v1836_v34  ;;  %960 = vmatprep.subr.bf16.mxu1 %v1838_v35  ;;  %v2104_v34 = vld [vmem:[#allocation4 + $0xe4] ss:$8 sps:$4 sm:$0xff]   ;;  %v2102_v35 = vld [vmem:[#allocation4 + $0xe0] ss:$8 sps:$4 sm:$0xff]  }
  0x97   :  { %920 = vmatpush1.bf16.msra.mxu0 %v1835_v40  ;;  %961 = vmatpush1.bf16.msra.mxu1 %v1837_v41  ;;  %v2110_v40 = vld [vmem:[#allocation4 + $0x190] ss:$8 sps:$4 sm:$0xff]  }
  0x98   :  { %921 = vmatprep.subr.bf16.mxu0 %v1844_v42  ;;  %962 = vmatprep.subr.bf16.mxu1 %v1846_v57  ;;  %v2111_v41 = vld [vmem:[#allocation4 + $0x110] ss:$8 sps:$4 sm:$0xff]   ;;  %v2112_v42 = vld [vmem:[#allocation4 + $0x1a0] ss:$8 sps:$4 sm:$0xff]  }
  0x99   :  { %v2113_v57 = vld [vmem:[#allocation4 + $0x120] ss:$8 sps:$4 sm:$0xff]  }
  0x9b   :  { %922 = vmatpush1.bf16.msra.mxu0 %v1843_v47  ;;  %963 = vmatpush1.bf16.msra.mxu1 %v1845_v48  ;;  %v2118_v47 = vld [vmem:[#allocation4 + $0x1d0] ss:$8 sps:$4 sm:$0xff]  }
  0x9c   :  { %923 = vmatprep.subr.bf16.mxu0 %v1852_v49  ;;  %964 = vmatprep.subr.bf16.mxu1 %v1854_v50  ;;  %v2119_v48 = vld [vmem:[#allocation4 + $0x150] ss:$8 sps:$4 sm:$0xff]   ;;  %v2120_v49 = vld [vmem:[#allocation4 + $0x1e0] ss:$8 sps:$4 sm:$0xff]  }
  0x9f   :  { %924 = vmatpush1.bf16.msra.mxu0 %v1851_v55  ;;  %965 = vmatpush1.bf16.msra.mxu1 %v1853_v56 }
  0xa0   :  { %925 = vmatprep.subr.bf16.mxu0 %v1860_v58  ;;  %966 = vmatprep.subr.bf16.mxu1 %v1862_v59 }
  0xa3   :  { %926 = vmatpush1.bf16.msra.mxu0 %v1859_v0  ;;  %967 = vmatpush1.bf16.msra.mxu1 %v1861_v1 }
  0xa4   :  { %927 = vmatprep.subr.bf16.mxu0 %v1868_v2  ;;  %968 = vmatprep.subr.bf16.mxu1 %v1870_v3 }
  0xa7   :  { %928 = vmatpush1.bf16.msra.mxu0 %v1867_v4  ;;  %969 = vmatpush1.bf16.msra.mxu1 %v1869_v5 }
  0xa8   :  { %1267 = vmatprep.subr.bf16.mxu0 %v2062_v7  ;;  %1943 = vmatprep.subr.bf16.mxu1 %v2108_v38  ;;  %v2131_v38 = vld [vmem:[#allocation4 + $0x270] ss:$8 sps:$4 sm:$0xff]  }
  0xaa   :  { %930 = vmatmul.mubr.bf16.vlgmr.msra.gmra.mrb[4].mxu0 %v2266_v14  ;;  %971 = vmatmul.mubr.bf16.vlgmr.msra.gmra.mrb[4].mxu1 %v2266_v14  ;;  %v2077_v14 = vld [vmem:[#allocation4 + $0x54] ss:$8 sps:$4 sm:$0xff]  }
  0xab   :  { %1268 = vmatpush1.bf16.msra.mxu0 %v2060_v6  ;;  %1944 = vmatpush3.bf16.msra.mxu1 %v2109_v39  ;;  %v2132_v39 = vld [vmem:[#allocation4 + $0x280] ss:$8 sps:$4 sm:$0xff]  }
  0xac   :  { %1269 = vmatprep.subr.bf16.mxu0 %v2065_v8  ;;  %1945 = vmatprep.subr.bf16.mxu1 %v2110_v40  ;;  %v2133_v40 = vld [vmem:[#allocation4 + $0x290] ss:$8 sps:$4 sm:$0xff]  }
  0xaf   :  { %1270 = vmatpush1.bf16.msra.mxu0 %v2063_v9  ;;  %1946 = vmatpush3.bf16.msra.mxu1 %v2111_v41  ;;  %v2134_v41 = vld [vmem:[#allocation4 + $0x2a0] ss:$8 sps:$4 sm:$0xff]  }
  0xb0   :  { %1271 = vmatprep.subr.bf16.mxu0 %v2068_v10  ;;  %1947 = vmatprep.subr.bf16.mxu1 %v2112_v42  ;;  %v2135_v42 = vld [vmem:[#allocation4 + $0x2b0] ss:$8 sps:$4 sm:$0xff]  }
  0xb3   :  { %1272 = vmatpush1.bf16.msra.mxu0 %v2066_v11  ;;  %1948 = vmatpush3.bf16.msra.mxu1 %v2113_v57  ;;  %v2136_v57 = vld [vmem:[#allocation4 + $0x2c0] ss:$8 sps:$4 sm:$0xff]  }
  0xb4   :  { %1273 = vmatprep.subr.bf16.mxu0 %v2071_v12  ;;  %1949 = vmatprep.subr.bf16.mxu1 %v2114_v43 }
  0xb7   :  { %1274 = vmatpush1.bf16.msra.mxu0 %v2069_v13  ;;  %1950 = vmatpush3.bf16.msra.mxu1 %v2115_v44 }
  0xb8   :  { %1275 = vmatprep.subr.bf16.mxu0 %v2074_v15  ;;  %1951 = vmatprep.subr.bf16.mxu1 %v2116_v45 }
  0xbb   :  { %1276 = vmatpush1.bf16.msra.mxu0 %v2072_v16  ;;  %1952 = vmatpush3.bf16.msra.mxu1 %v2117_v46 }
  0xbc   :  { %1277 = vmatprep.subr.bf16.mxu0 %v2077_v14  ;;  %1953 = vmatprep.subr.bf16.mxu1 %v2118_v47 }
  0xbf   :  { %1278 = vmatpush1.bf16.msra.mxu0 %v2075_v17  ;;  %1954 = vmatpush3.bf16.msra.mxu1 %v2119_v48 }
  0xc0   :  { %1279 = vmatprep.subr.bf16.mxu0 %v2080_v18  ;;  %1955 = vmatprep.subr.bf16.mxu1 %v2120_v49 }
  0xc3   :  { %1280 = vmatpush1.bf16.msra.mxu0 %v2078_v19  ;;  %v2121_v19 = vld [vmem:[#allocation4 + $0x160] ss:$8 sps:$4 sm:$0xff]  }
  0xc4   :  { %1281 = vmatprep.subr.bf16.mxu0 %v2083_v20  ;;  %1956 = vmatpush3.bf16.msra.mxu1 %v2121_v19  ;;  %v2122_v20 = vld [vmem:[#allocation4 + $0x1f0] ss:$8 sps:$4 sm:$0xff]  }
  0xc5   :  { %1957 = vmatprep.subr.bf16.mxu1 %v2122_v20 }
  0xc7   :  { %1282 = vmatpush1.bf16.msra.mxu0 %v2081_v21  ;;  %v2123_v21 = vld [vmem:[#allocation4 + $0x170] ss:$8 sps:$4 sm:$0xff]  }
  0xc8   :  { %1283 = vmatprep.subr.bf16.mxu0 %v2086_v22  ;;  %1958 = vmatpush3.bf16.msra.mxu1 %v2123_v21  ;;  %v2210_v22 = vmov 0.0  }
  0xc9   :  { %1992 = vmatprep.subr.bf16.mxu1 %v2210_v22 }
  0xcb   :  { %1284 = vmatpush1.bf16.msra.mxu0 %v2084_v23 }
  0xcc   :  { %1285 = vmatprep.subr.bf16.mxu0 %v2089_v24 }
  0xcf   :  { %1286 = vmatpush1.bf16.msra.mxu0 %v2087_v25 }
  0xd0   :  { %1287 = vmatprep.subr.bf16.mxu0 %v2092_v26 }
  0xd3   :  { %1288 = vmatpush1.bf16.msra.mxu0 %v2090_v27 }
  0xd4   :  { %1289 = vmatprep.subr.bf16.mxu0 %v2095_v28 }
  0xd7   :  { %1290 = vmatpush1.bf16.msra.mxu0 %v2093_v29 }
  0xd8   :  { %1291 = vmatprep.subr.bf16.mxu0 %v2098_v30  ;;  %v2124_v30 = vld [vmem:[#allocation4 + $0x200] ss:$8 sps:$4 sm:$0xff]  }
  0xdb   :  { %1292 = vmatpush1.bf16.msra.mxu0 %v2096_v31 }
  0xdc   :  { %1293 = vmatprep.subr.bf16.mxu0 %v2101_v32  ;;  %v2125_v32 = vld [vmem:[#allocation4 + $0x210] ss:$8 sps:$4 sm:$0xff]  }
  0xdf   :  { %1294 = vmatpush1.bf16.msra.mxu0 %v2099_v33  ;;  %v2126_v33 = vld [vmem:[#allocation4 + $0x220] ss:$8 sps:$4 sm:$0xff]  }
  0xe0   :  { %1295 = vmatprep.subr.bf16.mxu0 %v2104_v34  ;;  %v2127_v34 = vld [vmem:[#allocation4 + $0x230] ss:$8 sps:$4 sm:$0xff]  }
  0xe3   :  { %1296 = vmatpush1.bf16.msra.mxu0 %v2102_v35  ;;  %v2128_v35 = vld [vmem:[#allocation4 + $0x240] ss:$8 sps:$4 sm:$0xff]  }
  0xe4   :  { %1297 = vmatprep.subr.bf16.mxu0 %v2107_v36  ;;  %v2129_v36 = vld [vmem:[#allocation4 + $0x250] ss:$8 sps:$4 sm:$0xff]  }
  0xe7   :  { %1298 = vmatpush1.bf16.msra.mxu0 %v2105_v37  ;;  %v2130_v37 = vld [vmem:[#allocation4 + $0x260] ss:$8 sps:$4 sm:$0xff]  }
  0xe8   :  { %2012 = vmatprep.subr.bf16.mxu0 %v2210_v22 }
 0x13d   :  { %v849_v50 = vpop.f32.mrb[0].mxu0  ;;  %v890_v52 = vpop.f32.mrb[0].mxu1 }
 0x13e   :  { %v979_v51 = vmax.f32 %v849_v50, 0.0  ;;  %v851_v53 = vpop.f32.mrb[1].mxu0  ;;  %v981_v54 = vmax.f32 %v890_v52, 0.0  ;;  %v892_v56 = vpop.f32.mrb[1].mxu1  ;;  %v2137_v50 = vld [vmem:[#allocation4 + $0x2d0] ss:$8 sps:$4 sm:$0xff]  }
 0x13f   :  { %v980_v55 = vmax.f32 %v851_v53, 0.0  ;;  %v853_v58 = vpop.f32.mrb[2].mxu0  ;;  %v982_v59 = vmax.f32 %v892_v56, 0.0  ;;  %v894_v60 = vpop.f32.mrb[2].mxu1  ;;  %v2139_v52 = vld [vmem:[#allocation4 + $0x2f0] ss:$8 sps:$4 sm:$0xff]  }
 0x140   :  { %v854_v61 = vpop.f32.mrb[3].mxu0  ;;  %v987_v62 = vmax.f32 %v979_v51, %v981_v54  ;;  %v895_v63 = vpop.f32.mrb[3].mxu1  ;;  %v2138_v51 = vld [vmem:[#allocation4 + $0x2e0] ss:$8 sps:$4 sm:$0xff]   ;;  %v2141_v54 = vld [vmem:[#allocation4 + $0x310] ss:$8 sps:$4 sm:$0xff]  }
 0x141   :  { %v988_v0 = vmax.f32 %v980_v55, %v982_v59  ;;  %v2140_v53 = vld [vmem:[#allocation4 + $0x300] ss:$8 sps:$4 sm:$0xff]   ;;  %v2143_v56 = vld [vmem:[#allocation4 + $0x330] ss:$8 sps:$4 sm:$0xff]  }
 0x142   :  { %v2142_v55 = vld [vmem:[#allocation4 + $0x320] ss:$8 sps:$4 sm:$0xff]  }
 0x143   :  { %v2144_v58 = vld [vmem:[#allocation4 + $0x340] ss:$8 sps:$4 sm:$0xff]  }
 0x17d   :  { %v931_v1 = vpop.f32.mrb[4].mxu0  ;;  %v972_v3 = vpop.f32.mrb[4].mxu1 }
 0x17e   :  { %v983_v2 = vmax.f32 %v931_v1, 0.0  ;;  %v933_v4 = vpop.f32.mrb[5].mxu0  ;;  %v985_v5 = vmax.f32 %v972_v3, 0.0  ;;  %v974_v7 = vpop.f32.mrb[5].mxu1  ;;  %v2145_v1 = vld [vmem:[#allocation4 + $0x350] ss:$8 sps:$4 sm:$0xff]  }
 0x17f   :  { %v984_v6 = vmax.f32 %v933_v4, 0.0  ;;  %v935_v8 = vpop.f32.mrb[6].mxu0  ;;  %v986_v9 = vmax.f32 %v974_v7, 0.0  ;;  %v976_v10 = vpop.f32.mrb[6].mxu1  ;;  %v2147_v3 = vld [vmem:[#allocation4 + $0x370] ss:$8 sps:$4 sm:$0xff]  }
 0x180   :  { %v936_v11 = vpop.f32.mrb[7].mxu0  ;;  %v989_v12 = vmax.f32 %v983_v2, %v985_v5  ;;  %v977_v13 = vpop.f32.mrb[7].mxu1  ;;  %v2146_v2 = vld [vmem:[#allocation4 + $0x360] ss:$8 sps:$4 sm:$0xff]   ;;  %v1718_v10 = vlaneseq }
 0x181   :  { %v990_v15 = vmax.f32 %v984_v6, %v986_v9 }
 0x182   :  { %v991_v16 = vmax.f32 %v987_v62, %v989_v12  ;;  %v1719_v11 = vand.u32 127, %v1718_v10 }
 0x183   :  { %v992_v14 = vmax.f32 %v988_v0, %v990_v15 }
 0x184   :  { %v1105_v18 = vpack.c.bf16 %v991_v16, %v991_v16  ;;  %vm1733_vm1 = vcmp.eq.s32.totalorder %v1719_v11, 3  ;;  %vm1720_vm2 = vcmp.lt.s32.totalorder %v1719_v11, 3 }
 0x185   :  { %v1106_v17 = vpack.c.bf16 %v992_v14, %v992_v14 }
 0x187   :  { %1299 = vmatprep.mubr.bf16.mxu0 %v1106_v17 }
 0x188   :  { %1300 = vmatmul.mubr.bf16.vlgmr.msra.gmra.mrb[8].mxu0 %v1105_v18 }
 0x189   :  { %2028 = vmatprep.mubr.msk.bf16.mxu0 %vm2211_vm0, %v2210_v22  ;;  %2013 = vmatpush3.bf16.msra.mxu0 %v2132_v39 }
 0x18a   :  { %2014 = vmatprep.subr.bf16.mxu0 %v2210_v22 }
 0x18d   :  { %2015 = vmatpush3.bf16.msra.mxu0 %v2133_v40 }
 0x18e   :  { %2016 = vmatprep.subr.bf16.mxu0 %v2210_v22 }
 0x191   :  { %2017 = vmatpush3.bf16.msra.mxu0 %v2134_v41 }
 0x192   :  { %2018 = vmatprep.subr.bf16.mxu0 %v2210_v22 }
 0x195   :  { %2019 = vmatpush3.bf16.msra.mxu0 %v2135_v42 }
 0x196   :  { %2020 = vmatprep.subr.bf16.mxu0 %v2210_v22 }
 0x199   :  { %2021 = vmatpush3.bf16.msra.mxu0 %v2136_v57 }
 0x19a   :  { %2022 = vmatprep.subr.bf16.mxu0 %v2210_v22 }
 0x19d   :  { %2023 = vmatpush3.bf16.msra.mxu0 %v2137_v50 }
 0x19e   :  { %2024 = vmatprep.subr.bf16.mxu0 %v2210_v22 }
 0x1a1   :  { %2025 = vmatpush3.bf16.msra.mxu0 %v2138_v51 }
 0x1a2   :  { %2026 = vmatprep.subr.bf16.mxu0 %v2210_v22 }
 0x1a5   :  { %2027 = vmatpush3.bf16.msra.mxu0 %v2139_v52 }
 0x25b   :  { %v1301_v23 = vpop.f32.mrb[8].mxu0 }
 0x25c   :  { %v1308_v24 = vmax.f32 %v1301_v23, 0.0  ;;  %v1303_v25 = vpop.f32.mrb[9].mxu0 }
 0x25d   :  { %v1309_v26 = vmax.f32 %v1303_v25, 0.0  ;;  %v1305_v27 = vpop.f32.mrb[10].mxu0 }
 0x25e   :  { %v1306_v28 = vpop.f32.mrb[11].mxu0  ;;  %v1310_v31 = vpack.c.bf16 %v1308_v24, %v1308_v24 }
 0x25f   :  { %v1311_v29 = vpack.c.bf16 %v1309_v26, %v1309_v26 }
 0x261   :  { %1440 = vmatprep.mubr.bf16.mxu1 %v1311_v29 }
 0x262   :  { %1441 = vmatmul.mubr.bf16.vlgmr.msra.gmra.mrb[8].mxu1 %v1310_v31 }
 0x263   :  { %1993 = vmatpush3.bf16.msra.mxu1 %v2124_v30  ;;  %2008 = vmatprep.mubr.msk.bf16.mxu1 %vm2211_vm0, %v2210_v22 }
 0x264   :  { %1994 = vmatprep.subr.bf16.mxu1 %v2210_v22 }
 0x267   :  { %1995 = vmatpush3.bf16.msra.mxu1 %v2125_v32 }
 0x268   :  { %1996 = vmatprep.subr.bf16.mxu1 %v2210_v22 }
 0x26b   :  { %1997 = vmatpush3.bf16.msra.mxu1 %v2126_v33 }
 0x26c   :  { %1998 = vmatprep.subr.bf16.mxu1 %v2210_v22 }
 0x26f   :  { %1999 = vmatpush3.bf16.msra.mxu1 %v2127_v34 }
 0x270   :  { %2000 = vmatprep.subr.bf16.mxu1 %v2210_v22 }
 0x273   :  { %2001 = vmatpush3.bf16.msra.mxu1 %v2128_v35 }
 0x274   :  { %2002 = vmatprep.subr.bf16.mxu1 %v2210_v22 }
 0x277   :  { %2003 = vmatpush3.bf16.msra.mxu1 %v2129_v36 }
 0x278   :  { %2004 = vmatprep.subr.bf16.mxu1 %v2210_v22 }
 0x27b   :  { %2005 = vmatpush3.bf16.msra.mxu1 %v2130_v37 }
 0x27c   :  { %2006 = vmatprep.subr.bf16.mxu1 %v2210_v22 }
 0x27f   :  { %2007 = vmatpush3.bf16.msra.mxu1 %v2131_v38 }
 0x280   :  { %2032 = vmatprep.subr.bf16.mxu1 %v2210_v22 }
 0x335   :  { %v1959_v43 = vpop.f32.mrb[8].mxu1 }
 0x336   :  { %v1960_v44 = vpop.f32.mrb[9].mxu1 }
 0x337   :  { %v1961_v45 = vadd.f32 %v1960_v44, %v1959_v43  ;;  %v1962_v46 = vpop.f32.mrb[10].mxu1 }
 0x338   :  { %v1963_v47 = vpop.f32.mrb[11].mxu1 }
 0x339   :  { %v1448_v48 = vmax.f32 %v1961_v45, 0.0 }
 0x33b   :  { %v1449_v49 = vpack.c.bf16 %v1448_v48, %v1448_v48 }
 0x33d   :  { %2009 = vmatmul.mubr.bf16.vlgmr.msra.gmra.mrb[12].mxu1 %v1449_v49 }
 0x33e   :  { %2048 = vmatprep.mubr.msk.bf16.mxu1 %vm2211_vm0, %v2210_v22  ;;  %2033 = vmatpush3.bf16.msra.mxu1 %v2140_v53 }
 0x33f   :  { %2034 = vmatprep.subr.bf16.mxu1 %v2210_v22 }
 0x342   :  { %2035 = vmatpush3.bf16.msra.mxu1 %v2141_v54 }
 0x343   :  { %2036 = vmatprep.subr.bf16.mxu1 %v2210_v22 }
 0x346   :  { %2037 = vmatpush3.bf16.msra.mxu1 %v2142_v55 }
 0x347   :  { %2038 = vmatprep.subr.bf16.mxu1 %v2210_v22 }
 0x34a   :  { %2039 = vmatpush3.bf16.msra.mxu1 %v2143_v56 }
 0x34b   :  { %2040 = vmatprep.subr.bf16.mxu1 %v2210_v22 }
 0x34e   :  { %2041 = vmatpush3.bf16.msra.mxu1 %v2144_v58 }
 0x34f   :  { %2042 = vmatprep.subr.bf16.mxu1 %v2210_v22 }
 0x352   :  { %2043 = vmatpush3.bf16.msra.mxu1 %v2145_v1 }
 0x353   :  { %2044 = vmatprep.subr.bf16.mxu1 %v2210_v22 }
 0x356   :  { %2045 = vmatpush3.bf16.msra.mxu1 %v2146_v2 }
 0x357   :  { %2046 = vmatprep.subr.bf16.mxu1 %v2210_v22 }
 0x35a   :  { %2047 = vmatpush3.bf16.msra.mxu1 %v2147_v3 }
 0x410   :  { %v1532_v59 = vpop.f32.mrb[12].mxu1 }
 0x411   :  { %2148 = vtanh.f32 %v1532_v59  ;;  %v2010_v60 = vpop.f32.mrb[13].mxu1 }
 0x412   :  { %v1535_v61 = vpop.f32.mrb[14].mxu1 }
 0x413   :  { %v2011_v62 = vpop.f32.mrb[15].mxu1 }
 0x41b   :  { %v2149_v63 = vpop.eup %2148 }
 0x41c   :  { %v1539_v0 = vpack.c.bf16 %v2149_v63, %v2149_v63 }
 0x41e   :  { %2029 = vmatmul.mubr.bf16.vlgmr.msra.gmra.mrb[12].mxu0 %v1539_v0 }
 0x4f1   :  { %v1622_v4 = vpop.f32.mrb[12].mxu0 }
 0x4f2   :  { %2150 = vtanh.f32 %v1622_v4  ;;  %v2030_v5 = vpop.f32.mrb[13].mxu0 }
 0x4f3   :  { %v1625_v6 = vpop.f32.mrb[14].mxu0 }
 0x4f4   :  { %v2031_v7 = vpop.f32.mrb[15].mxu0 }
 0x4fc   :  { %v2151_v8 = vpop.eup %2150 }
 0x4fd   :  { %v1629_v9 = vpack.c.bf16 %v2151_v8, %v2151_v8 }
 0x4ff   :  { %2049 = vmatmul.mubr.bf16.vlgmr.msra.gmra.mrb[16].mxu1 %v1629_v9 }
 0x5d2   :  { %v1712_v12 = vpop.f32.mrb[16].mxu1 }
 0x5d3   :  { %v1734_v13 = vsel %vm1733_vm1, %v1712_v12, 0.0  ;;  %v2050_v15 = vpop.f32.mrb[17].mxu1  ;;  %v1721_v16 = vsel %vm1720_vm2, %v1712_v12, -1e+30 }
 0x5d4   :  { %1722 = vmax.xlane.f32.xlu0 %v1721_v16  ;;  %v1715_v14 = vpop.f32.mrb[18].mxu1 }
 0x5d5   :  { %v2051_v17 = vpop.f32.mrb[19].mxu1 }
 0x661   :  { %v1723_v18 = vpop.xlane.xlu0 %1722 }
 0x662   :  { %v1724_v19 = vsub.f32 %v1712_v12, %v1723_v18 }
 0x664   :  { %v1725_v20 = vmul.f32 1.442695, %v1724_v19 }
 0x666   :  { %2152 = vpow2.f32 %v1725_v20 }
 0x670   :  { %v2153_v21 = vpop.eup %2152 }
 0x671   :  { %v1727_v22 = vsel %vm1720_vm2, %v2153_v21, 0.0 }
 0x672   :  { %1728 = vadd.xlane.f32.xlu0 %v1727_v22 }
 0x6ff   :  { %v1729_v23 = vpop.xlane.xlu0 %1728 }
 0x700   :  { %2154 = vlog2.f32 %v1729_v23 }
 0x70a   :  { %v2155_v24 = vpop.eup %2154 }
 0x70b   :  { %v1731_v25 = vmul.f32 0.6931472, %v2155_v24 }
 0x70d   :  { %v1732_v26 = vsub.f32 %v1724_v19, %v1731_v25 }
 0x70f   :  { %v1735_v27 = vsel %vm1720_vm2, %v1732_v26, %v1734_v13 }
 0x710   :  { %1736 = vst [vmem:[%s2313_s3] sm:$0xff] %v1735_v27 }
 0x711   :  { %1741 = vsyncpa [#allocation3], 1 }
 0x712   :  { %1742 = vsyncpa [#allocation5], 1 }

</bundles_post_ra>
